<compile_context>
chip_gen: v5e
topology: v5e:2x2
jax: 0.10.0
libtpu: 0.0.40
codegen_flags: <defaults>
</compile_context>

<pallas_src>
import jax
import jax.numpy as jnp
from jax.experimental import pallas as pl
from jax.experimental.pallas import tpu as pltpu


def _round_up(n, m):
    return pl.cdiv(n, m) * m


def mlp_kernel(xt_ref, w1_ref, b1_ref, w2_ref, b2_ref, o_ref):
    # All operands VMEM-resident; batch on the lane axis.
    #   H^T = W1 (10,10) @ X^T (10,TB)           -> (10,TB)
    #   Y^T = W2 (5,10)  @ relu(H^T + b1)        -> (5,TB)
    xt = xt_ref[...]
    h = jnp.dot(w1_ref[...], xt, preferred_element_type=jnp.float32)   # MXU, f32 acc
    h = jnp.maximum(h + b1_ref[...], 0.0)        # bias + ReLU in f32 (cheap on v5e/v6e/v7x)
    y = jnp.dot(w2_ref[...], h, preferred_element_type=jnp.float32)
    o_ref[...] = (y + b2_ref[...]).astype(o_ref.dtype)


def toy_model_forward(x, w1, b1, w2, b2, *, tile_b=512, input_dtype=None):
    """ToyModel forward: relu(x @ w1.T + b1) @ w2.T + b2.

    x:  (B, 10)
    w1: (10, 10) torch layout (out, in);  b1: (10,)
    w2: (5, 10)  torch layout (out, in);  b2: (5,)
    Returns (B, 5).
    `input_dtype=jnp.bfloat16` optionally halves the B-scaled HBM traffic (v6e/v7x);
    accumulation and the bias/ReLU epilogue stay in f32 either way.
    """
    B, in_features = x.shape
    out1 = w1.shape[0]
    out2 = w2.shape[0]

    # Lane-dense tiling: tile must be a multiple of 128 lanes; pad B up to a tile multiple.
    tile_b = min(tile_b, _round_up(B, 128))
    padded_b = _round_up(B, tile_b)
    grid = (padded_b // tile_b,)

    xt = x.T                                              # (10, B) — batch on lanes
    if padded_b != B:
        xt = jnp.pad(xt, ((0, 0), (0, padded_b - B)))     # zero tail, sliced off below

    if input_dtype is not None:
        xt = xt.astype(input_dtype)
        w1 = w1.astype(input_dtype)
        w2 = w2.astype(input_dtype)

    b1c = b1.reshape(out1, 1).astype(jnp.float32)         # broadcast across lanes
    b2c = b2.reshape(out2, 1).astype(jnp.float32)

    yt = pl.pallas_call(
        mlp_kernel,
        out_shape=jax.ShapeDtypeStruct((out2, padded_b), x.dtype),
        grid=grid,
        in_specs=[
            pl.BlockSpec((in_features, tile_b), lambda i: (0, i)),   # x^T tile (pipelined)
            pl.BlockSpec((out1, in_features), lambda i: (0, 0)),     # W1, VMEM-resident
            pl.BlockSpec((out1, 1), lambda i: (0, 0)),               # b1, VMEM-resident
            pl.BlockSpec((out2, in_features), lambda i: (0, 0)),     # W2, VMEM-resident
            pl.BlockSpec((out2, 1), lambda i: (0, 0)),               # b2, VMEM-resident
        ],
        out_specs=pl.BlockSpec((out2, tile_b), lambda i: (0, i)),    # lane-dense output
        compiler_params=pltpu.CompilerParams(
            # "parallel" B axis shards tiles across v7x's 2 TensorCores; no-op on v5e/v6e.
            dimension_semantics=("parallel",),
            # Explicit budget: tiles are tiny (~tens of KiB double-buffered), safe on
            # v7x's 64 MiB physical VMEM as well as v5e/v6e's 128 MiB.
            vmem_limit_bytes=32 * 1024 * 1024,
        ),
    )(xt, w1, b1c, w2, b2c)

    return yt[:, :B].T                                    # back to (B, 5)


if __name__ == "__main__":
    key = jax.random.PRNGKey(0)
    k_x, k_w1, k_b1, k_w2, k_b2, k_x2 = jax.random.split(key, 6)

    # Deterministic synthetic parameters (torch nn.Linear shapes: (out, in) / (out,)).
    w1 = jax.random.uniform(k_w1, (10, 10), minval=-0.3, maxval=0.3, dtype=jnp.float32)
    b1 = jax.random.uniform(k_b1, (10,), minval=-0.3, maxval=0.3, dtype=jnp.float32)
    w2 = jax.random.uniform(k_w2, (5, 10), minval=-0.3, maxval=0.3, dtype=jnp.float32)
    b2 = jax.random.uniform(k_b2, (5,), minval=-0.3, maxval=0.3, dtype=jnp.float32)

    def ref(x):
        return jnp.maximum(x @ w1.T + b1, 0.0) @ w2.T + b2

    # Tiny batch (as in the DDP test). NOTE: at B=8 this is pure per-call overhead and
    # plain XLA would be at least as fast; the kernel only pays off at large B.
    x_small = jax.random.normal(k_x, (8, 10), dtype=jnp.float32)
    out_small = jax.block_until_ready(toy_model_forward(x_small, w1, b1, w2, b2))
    assert out_small.shape == (8, 5)
    assert jnp.allclose(out_small, ref(x_small), atol=1e-5, rtol=1e-5)

    # Ragged multi-tile batch: exercises the B-grid, resident weights, and padded tail.
    x_big = jax.random.normal(k_x2, (300, 10), dtype=jnp.float32)
    out_big = jax.block_until_ready(toy_model_forward(x_big, w1, b1, w2, b2, tile_b=128))
    assert out_big.shape == (300, 5)
    assert jnp.allclose(out_big, ref(x_big), atol=1e-5, rtol=1e-5)

    print("KERNEL_OK")
</pallas_src>

<mosaic_0001>
module attributes {stable_mosaic.version = 11 : i64} {
  func.func @mlp_kernel(%arg0: i32, %arg1: memref<10x128xf32, #tpu.memory_space<vmem>>, %arg2: memref<10x10xf32, #tpu.memory_space<vmem>>, %arg3: memref<10x1xf32, #tpu.memory_space<vmem>>, %arg4: memref<5x10xf32, #tpu.memory_space<vmem>>, %arg5: memref<5x1xf32, #tpu.memory_space<vmem>>, %arg6: memref<5x128xf32, #tpu.memory_space<vmem>>) attributes {dimension_semantics = [#tpu.dimension_semantics<parallel>], iteration_bounds = array<i64: 1>, scalar_prefetch = 0 : i64, scratch_operands = 0 : i64, tpu.core_type = #tpu.core_type<tc>, window_params = [{transform_indices = @transform_0, window_bounds = array<i64: 10, 128>}, {pipeline_mode = #tpu.pipeline_mode<synchronous>, transform_indices = @transform_1, window_bounds = array<i64: 10, 10>}, {pipeline_mode = #tpu.pipeline_mode<synchronous>, transform_indices = @transform_2, window_bounds = array<i64: 10, 1>}, {pipeline_mode = #tpu.pipeline_mode<synchronous>, transform_indices = @transform_3, window_bounds = array<i64: 5, 10>}, {pipeline_mode = #tpu.pipeline_mode<synchronous>, transform_indices = @transform_4, window_bounds = array<i64: 5, 1>}, {transform_indices = @transform_5, window_bounds = array<i64: 5, 128>}]} {
    %c0 = arith.constant 0 : index
    %c0_0 = arith.constant 0 : index
    %0 = vector.load %arg1[%c0, %c0_0] : memref<10x128xf32, #tpu.memory_space<vmem>>, vector<10x128xf32>
    %c0_1 = arith.constant 0 : index
    %c0_2 = arith.constant 0 : index
    %1 = vector.load %arg2[%c0_1, %c0_2] : memref<10x10xf32, #tpu.memory_space<vmem>>, vector<10x10xf32>
    %cst = arith.constant dense<0.000000e+00> : vector<10x128xf32>
    %2 = tpu.matmul %1, %0, %cst {dimension_numbers = #tpu.dot_dimension_numbers<[1], [0], [0], [1], [0, 0, 1, 1], [], []>} : vector<10x10xf32>, vector<10x128xf32>, vector<10x128xf32> -> vector<10x128xf32>
    %c0_3 = arith.constant 0 : index
    %c0_4 = arith.constant 0 : index
    %3 = vector.load %arg3[%c0_3, %c0_4] : memref<10x1xf32, #tpu.memory_space<vmem>>, vector<10x1xf32>
    %4 = vector.broadcast %3 : vector<10x1xf32> to vector<10x128xf32>
    %5 = arith.addf %2, %4 : vector<10x128xf32>
    %cst_5 = arith.constant 0.000000e+00 : f32
    %6 = vector.broadcast %cst_5 : f32 to vector<10x128xf32>
    %7 = arith.maximumf %5, %6 : vector<10x128xf32>
    %c0_6 = arith.constant 0 : index
    %c0_7 = arith.constant 0 : index
    %8 = vector.load %arg4[%c0_6, %c0_7] : memref<5x10xf32, #tpu.memory_space<vmem>>, vector<5x10xf32>
    %cst_8 = arith.constant dense<0.000000e+00> : vector<5x128xf32>
    %9 = tpu.matmul %8, %7, %cst_8 {dimension_numbers = #tpu.dot_dimension_numbers<[1], [0], [0], [1], [0, 0, 1, 1], [], []>} : vector<5x10xf32>, vector<10x128xf32>, vector<5x128xf32> -> vector<5x128xf32>
    %c0_9 = arith.constant 0 : index
    %c0_10 = arith.constant 0 : index
    %10 = vector.load %arg5[%c0_9, %c0_10] : memref<5x1xf32, #tpu.memory_space<vmem>>, vector<5x1xf32>
    %11 = vector.broadcast %10 : vector<5x1xf32> to vector<5x128xf32>
    %12 = arith.addf %9, %11 : vector<5x128xf32>
    %c0_11 = arith.constant 0 : index
    %c0_12 = arith.constant 0 : index
    %13 = vector.load %arg6[%c0_11, %c0_12] : memref<5x128xf32, #tpu.memory_space<vmem>>, vector<5x128xf32>
    tpu.vector_store %arg6[%c0_11, %c0_12], %12 {strides = array<i32>} : memref<5x128xf32, #tpu.memory_space<vmem>>, vector<5x128xf32>,
    return
  }
  func.func @transform_0(%arg0: i32) -> (i32, i32) {
    %c0_i32 = arith.constant 0 : i32
    %c0_i32_0 = arith.constant 0 : i32
    return %c0_i32, %arg0 : i32, i32
  }
  func.func @transform_1(%arg0: i32) -> (i32, i32) {
    %c0_i32 = arith.constant 0 : i32
    %c0_i32_0 = arith.constant 0 : i32
    %c0_i32_1 = arith.constant 0 : i32
    return %c0_i32, %c0_i32_0 : i32, i32
  }
  func.func @transform_2(%arg0: i32) -> (i32, i32) {
    %c0_i32 = arith.constant 0 : i32
    %c0_i32_0 = arith.constant 0 : i32
    %c0_i32_1 = arith.constant 0 : i32
    return %c0_i32, %c0_i32_0 : i32, i32
  }
  func.func @transform_3(%arg0: i32) -> (i32, i32) {
    %c0_i32 = arith.constant 0 : i32
    %c0_i32_0 = arith.constant 0 : i32
    %c0_i32_1 = arith.constant 0 : i32
    return %c0_i32, %c0_i32_0 : i32, i32
  }
  func.func @transform_4(%arg0: i32) -> (i32, i32) {
    %c0_i32 = arith.constant 0 : i32
    %c0_i32_0 = arith.constant 0 : i32
    %c0_i32_1 = arith.constant 0 : i32
    return %c0_i32, %c0_i32_0 : i32, i32
  }
  func.func @transform_5(%arg0: i32) -> (i32, i32) {
    %c0_i32 = arith.constant 0 : i32
    %c0_i32_0 = arith.constant 0 : i32
    return %c0_i32, %arg0 : i32, i32
  }
}

</mosaic_0001>

<bundles_post_ra>
// kernel: tpu_custom_call.1
= control target key start
LH: loop header
LB: loop body
LE: loop exit
PB: predicated region body
PF: predicated region fallthrough
CT: control target
= control target key end

     0   :  { %10 = vsyncpa [#allocation3], 0  ;;  %s271_s0 = inlined_call_operand.vmem [shape: f32[10,128], index: 0, kind: input, shape index: {}]   ;;  %s272_s1 = inlined_call_operand.hbm [shape: f32[10,10], index: 1, kind: input, shape index: {}]   ;;  %s273_s2 = inlined_call_operand.vmem [shape: f32[10,1], index: 2, kind: input, shape index: {}]   ;;  %s274_s3 = inlined_call_operand.vmem [shape: f32[5,10], index: 3, kind: input, shape index: {}]   ;;  %s275_s4 = inlined_call_operand.vmem [shape: f32[5,1], index: 4, kind: input, shape index: {}]   ;;  %s276_s5 = inlined_call_operand.hbm [shape: f32[5,128], index: 5, kind: output, shape index: {}]  }
   0x1   :  { %11 = vsyncpa [#allocation4], 0  ;;  %s18_s20 = sshll.u32 %s272_s1, 4  ;;  %s206_s21 = smov [#allocation2]   ;;  %s19_s20 = int_to_ptr.hbm [resolvable:$true] %s18_s20 }
   0x2   :  { %s20_s22 = sshll.u32 %s206_s21, 4  ;;  %s207_s23 = smov 128   ;;  %s21_s22 = int_to_ptr.vmem [resolvable:$true] %s20_s22 }
   0x3   :  { %s208_s24 = smov 8  }
   0x4   :  { %26 = dma.hbm_to_vmem [thread:$0]  %s19_s20, 256, %s21_s22, [#allocation3], %s207_s23, %s207_s23, %s208_s24  }
   0x5   :  { %202 = dma.done.wait [#allocation3], 256  }
   0x6   :  { %203 = vsyncadd [#allocation3], 4294967040  ;;  %v209_v0 = vmov 0   ;;  %vm60_vm0 = vcmask 1041408   ;;  %v38_v1 = vld [vmem:[%s271_s0 + $0x8] sm:$0x3] }
   0x7   :  { %152 = vset.pattern.permute.xlu0 %v209_v0  ;;  %153 = vset.pattern.permute.xlu1 %v209_v0  ;;  %v37_v2 = vld [vmem:[%s271_s0] sm:$0xff]  ;;  %vm53_vm1 = vcmask 80896   ;;  %v40_v4 = vld [vmem:[#allocation2 + $0x8] sm:$0x3]  ;;  %s130_s12 = sshll.u32 %s276_s5, 4  ;;  %s131_s12 = int_to_ptr.hbm [resolvable:$true] %s130_s12 }
   0x8   :  { %140 = vmatpush.msk.msra.mxu0 %vm60_vm0, %v38_v1  ;;  %145 = vmatpush.msk.msra.mxu2 %vm60_vm0, %v38_v1  ;;  %v39_v3 = vld [vmem:[#allocation2] sm:$0xff]  ;;  %v42_v5 = vld [vmem:[%s273_s2 + $0x8] sm:$0x3] }
   0x9   :  { %50 = vperm.xlu0 %152, %v42_v5   ;;  %v41_v6 = vld [vmem:[%s273_s2] sm:$0xff]  ;;  %s210_s2 = smov [#allocation5]  }
   0xa   :  { %79 = vmatpush.msra.mxu0 %v37_v2  ;;  %146 = vmatpush.msra.mxu2 %v37_v2  ;;  %v90_v7 = vld [vmem:[%s275_s4] sm:$0x1f]  ;;  %s128_s4 = sshll.u32 %s210_s2, 4  ;;  %s129_s4 = int_to_ptr.vmem [resolvable:$true] %s128_s4 }
   0xb   :  { %141 = vmatmul.msk.f32.vlgmr.msra.gmra.mxu0 %vm53_vm1, %v39_v3  ;;  %142 = vmatmul.msk.f32.vlgmr.msra.gmra.mxu2 %vm53_vm1, %v40_v4  ;;  %v89_v16 = vld [vmem:[%s274_s3] sm:$0x1f] }
   0xc   :  { %93 = vperm.xlu1 %153, %v90_v7  }
  0x11   :  { %45 = vperm.xlu0 %152, %v41_v6  }
  0x7b   :  { %v51_v8 = vpop.permute.xlu0 %50 }
  0x7e   :  { %v94_v17 = vpop.permute.xlu1 %93 }
  0x83   :  { %v46_v9 = vpop.permute.xlu0 %45 }
  0x88   :  { %v81_v10 = vpop.f32.mrf.mxu0 }
  0x89   :  { %v82_v12 = vadd.f32 %v81_v10, %v46_v9 }
  0x8b   :  { %v87_v15 = vmax.f32 %v82_v12, 0.0 }
  0x8e   :  { %v84_v11 = vpop.f32.mrf.mxu2 }
  0x8f   :  { %v85_v13 = vadd.f32 %v84_v11, %v51_v8 }
  0x91   :  { %v88_v14 = vmax.f32 %v85_v13, 0.0 }
  0x93   :  { %143 = vmatpush.msk.msra.mxu1 %vm60_vm0, %v88_v14 }
  0x95   :  { %117 = vmatpush.msra.mxu1 %v87_v15 }
  0x96   :  { %144 = vmatmul.msk.f32.vlgmr.msra.gmra.mxu1 %vm53_vm1, %v89_v16 }
 0x113   :  { %v119_v18 = vpop.f32.mrf.mxu1 }
 0x114   :  { %v120_v19 = vadd.f32 %v119_v18, %v94_v17 }
 0x116   :  { %122 = vst [vmem:[#allocation5] sm:$0x1f] %v120_v19 }
 0x117   :  { %133 = dma.vmem_to_hbm [thread:$0]  %s129_s4, 128, %s131_s12, [#allocation4]  }
 0x118   :  { %204 = dma.done.wait [#allocation4], 128  }
 0x119   :  { %205 = vsyncadd [#allocation4], 4294967168 }
 0x11a   :  { %138 = vsyncpa [#allocation3], 1 }
 0x11b   :  { %139 = vsyncpa [#allocation4], 1 }

</bundles_post_ra>
